<compile_context>
chip_gen: v7x
topology: tpu7x:2x2x1
jax: 0.10.0
libtpu: 0.0.40
codegen_flags: <defaults>
</compile_context>

<pallas_src>
import jax
import jax.numpy as jnp
from jax.experimental import pallas as pl
from jax.experimental.pallas import tpu as pltpu


def _attentive_pooling_kernel(feats_ref, mask_ref, w1t_ref, w2row_ref,
                              wfct_ref, bfc_ref, out_ref, attw_ref):
    tb, a, d = feats_ref.shape

    x3 = feats_ref[...]                       # (TB, A, D), matmul dtype
    # Fold batch rows into the matmul M dimension (A is a multiple of the
    # sublane tile at the shapes used here, so this is a cheap re-view).
    x2 = x3.reshape(tb * a, d)

    # feat2att (no bias) + tanh; accumulate / elementwise in f32.
    h = jnp.tanh(jnp.dot(x2, w1t_ref[...],
                         preferred_element_type=jnp.float32))     # (TB*A, H)

    # to_alpha (no bias): degenerate N=1 matmul -> VPU multiply + lane reduce.
    h3 = h.reshape(tb, a, -1)                                     # (TB, A, H)
    alpha = jnp.sum(h3 * w2row_ref[...], axis=-1)                 # (TB, A)

    # masked_fill(mask == 0, -1e9) in the lane-dense (TB, A) layout.
    alpha = jnp.where(mask_ref[...] == 0.0, jnp.float32(-1e9), alpha)

    # softmax over A (lane reductions).
    amax = jnp.max(alpha, axis=-1, keepdims=True)                 # (TB, 1)
    e = jnp.exp(alpha - amax)                                     # (TB, A)
    attw = e / jnp.sum(e, axis=-1, keepdims=True)                 # (TB, A)

    # attended feature: weighted sum over A (VPU mul + sublane reduce).
    att = jnp.sum(attw[:, :, None] * x3.astype(jnp.float32), axis=1)  # (TB, D)

    # fc embedding (with bias).
    out = jnp.dot(att.astype(wfct_ref.dtype), wfct_ref[...],
                  preferred_element_type=jnp.float32) + bfc_ref[...]

    out_ref[...] = out.astype(out_ref.dtype)
    attw_ref[...] = attw.astype(attw_ref.dtype)


def _choose_batch_block(B, A, target_rows=256):
    """Pick TB so that TB*A rows feed the MXU in one matmul. TB is a multiple
    of 8 whenever the grid has more than one step (2-D block tiling rule)."""
    tb = max(1, target_rows // max(A, 1))
    if tb >= B:
        return B, B
    tb = max(8, (tb // 8) * 8)
    if tb >= B:
        return B, B
    b_pad = -(-B // tb) * tb
    return tb, b_pad


def attentive_pooling(feats, f_masks, w_feat2att, w_to_alpha, w_fc, b_fc,
                      *, matmul_dtype=jnp.float32):
    """feats: [B, A, D] (or [B, W, H, D]) f32; f_masks: [B, A] or None;
       w_feat2att: [H, D]; w_to_alpha: [1, H]; w_fc: [D, D]; b_fc: [D]."""
    if feats.ndim == 4:
        b_, w_, h_, d_ = feats.shape
        feats = feats.reshape(b_, w_ * h_, d_)
    B, A, D = feats.shape
    H = w_feat2att.shape[0]

    if f_masks is None:
        mask = jnp.ones((B, A), dtype=jnp.float32)
    else:
        mask = f_masks.astype(jnp.float32).reshape(B, A)

    TB, B_pad = _choose_batch_block(B, A)
    if B_pad != B:
        feats = jnp.pad(feats, ((0, B_pad - B), (0, 0), (0, 0)))
        mask = jnp.pad(mask, ((0, B_pad - B), (0, 0)))  # padded rows fully masked

    mm_dt = jnp.dtype(matmul_dtype)
    feats_c = feats.astype(mm_dt)
    w1t = w_feat2att.T.astype(mm_dt)                        # (D, H)
    w2row = w_to_alpha.reshape(1, H).astype(jnp.float32)    # (1, H), VPU operand
    wfct = w_fc.T.astype(mm_dt)                             # (D, D)
    bfc2 = b_fc.reshape(1, D).astype(jnp.float32)           # (1, D)

    n_blocks = B_pad // TB
    out_shapes = (
        jax.ShapeDtypeStruct((B_pad, D), jnp.float32),
        jax.ShapeDtypeStruct((B_pad, A), jnp.float32),
    )

    # VMEM budget: double-buffered streamed blocks + resident weight blocks.
    isz = mm_dt.itemsize
    stream_bytes = 2 * (TB * A * D * isz + TB * A * 4 + TB * D * 4 + TB * A * 4)
    weight_bytes = 2 * (D * H * isz + H * 4 + D * D * isz + D * 4)
    vmem_limit = int(min(100 * 2 ** 20,
                         max(4 * (stream_bytes + weight_bytes), 16 * 2 ** 20)))

    cost = pl.CostEstimate(
        flops=int(B_pad * (2 * A * D * H + 2 * A * H + 8 * A
                           + 2 * A * D + 2 * D * D + D)),
        transcendentals=int(B_pad * A * (H + 1)),
        bytes_accessed=int(feats_c.size * isz + mask.size * 4
                           + w1t.size * isz + w2row.size * 4
                           + wfct.size * isz + bfc2.size * 4
                           + B_pad * D * 4 + B_pad * A * 4),
    )

    att_out, attw = pl.pallas_call(
        _attentive_pooling_kernel,
        out_shape=out_shapes,
        grid_spec=pltpu.PrefetchScalarGridSpec(
            num_scalar_prefetch=0,
            grid=(n_blocks,),
            in_specs=[
                pl.BlockSpec((TB, A, D), lambda b: (b, 0, 0)),   # feats
                pl.BlockSpec((TB, A), lambda b: (b, 0)),         # mask (lane-dense)
                pl.BlockSpec((D, H), lambda b: (0, 0)),          # w_feat2att^T
                pl.BlockSpec((1, H), lambda b: (0, 0)),          # w_to_alpha row
                pl.BlockSpec((D, D), lambda b: (0, 0)),          # w_fc^T
                pl.BlockSpec((1, D), lambda b: (0, 0)),          # b_fc
            ],
            out_specs=[
                pl.BlockSpec((TB, D), lambda b: (b, 0)),         # att_feats
                pl.BlockSpec((TB, A), lambda b: (b, 0)),         # attw
            ],
        ),
        compiler_params=pltpu.CompilerParams(
            dimension_semantics=("parallel",),
            vmem_limit_bytes=vmem_limit),
        cost_estimate=cost,
    )(feats_c, mask, w1t, w2row, wfct, bfc2)

    # TODO(synk): for very large D on v7x (64 MiB VMEM) additionally tile
    # w_fc^T over its output dimension with a second grid axis.
    return att_out[:B], attw[:B]


def _reference(feats, f_masks, w1, w2, wfc, bfc):
    """Pure-JAX reference mirroring the PyTorch forward."""
    attn_f = feats @ w1.T
    dot = jnp.tanh(attn_f)
    alpha = dot @ w2.T                                 # [B, A, 1]
    if f_masks is not None:
        alpha = jnp.where(f_masks[..., None] == 0, -1e9, alpha)
    attw = jax.nn.softmax(alpha.squeeze(-1), axis=-1)  # [B, A]
    att = jnp.einsum("ba,bad->bd", attw, feats)
    out = att @ wfc.T + bfc
    return out, attw


if __name__ == "__main__":
    key = jax.random.PRNGKey(0)

    def make_case(k, B, A, D):
        H = D // 2
        ks = jax.random.split(k, 6)
        feats = jax.random.normal(ks[0], (B, A, D), dtype=jnp.float32)
        f_masks = (jax.random.uniform(ks[1], (B, A)) > 0.25).astype(jnp.float32)
        w1 = jax.random.normal(ks[2], (H, D), dtype=jnp.float32) * 0.1
        w2 = jax.random.normal(ks[3], (1, H), dtype=jnp.float32) * 0.1
        wfc = jax.random.normal(ks[4], (D, D), dtype=jnp.float32) * 0.1
        bfc = jax.random.normal(ks[5], (D,), dtype=jnp.float32) * 0.1
        return feats, f_masks, w1, w2, wfc, bfc

    k1, k2 = jax.random.split(key)

    # Case 1: EMB_DIM = 32 (H = 16), small batch, f32 matmuls (tight check).
    feats, f_masks, w1, w2, wfc, bfc = make_case(k1, B=2, A=16, D=32)
    out, attw = attentive_pooling(feats, f_masks, w1, w2, wfc, bfc)
    jax.block_until_ready((out, attw))
    ref_out, ref_attw = _reference(feats, f_masks, w1, w2, wfc, bfc)
    assert jnp.allclose(out, ref_out, atol=1e-4, rtol=1e-4)
    assert jnp.allclose(attw, ref_attw, atol=1e-5, rtol=1e-5)

    # Case 2: batch-blocked grid (TB=16, batch padded 20->32) + an all-masked row.
    feats2, f_masks2, w1b, w2b, wfcb, bfcb = make_case(k2, B=20, A=16, D=32)
    f_masks2 = f_masks2.at[3].set(0.0)   # fully-masked row -> uniform weights
    out2, attw2 = attentive_pooling(feats2, f_masks2, w1b, w2b, wfcb, bfcb)
    jax.block_until_ready((out2, attw2))
    ref_out2, ref_attw2 = _reference(feats2, f_masks2, w1b, w2b, wfcb, bfcb)
    assert jnp.allclose(out2, ref_out2, atol=1e-4, rtol=1e-4)
    assert jnp.allclose(attw2, ref_attw2, atol=1e-5, rtol=1e-5)

    # Case 3: bf16 MXU operands (v6e/v7x path); elementwise math stays f32.
    out3, attw3 = attentive_pooling(feats, f_masks, w1, w2, wfc, bfc,
                                    matmul_dtype=jnp.bfloat16)
    jax.block_until_ready((out3, attw3))
    assert jnp.allclose(out3, ref_out, atol=2e-2, rtol=2e-2)
    assert jnp.allclose(attw3, ref_attw, atol=2e-2, rtol=2e-2)

    print("KERNEL_OK")
</pallas_src>

<mosaic_0001>
module attributes {stable_mosaic.version = 11 : i64} {
  func.func @_attentive_pooling_kernel(%arg0: i32, %arg1: memref<2x16x32xf32, #tpu.memory_space<vmem>>, %arg2: memref<2x16xf32, #tpu.memory_space<vmem>>, %arg3: memref<32x16xf32, #tpu.memory_space<vmem>>, %arg4: memref<1x16xf32, #tpu.memory_space<vmem>>, %arg5: memref<32x32xf32, #tpu.memory_space<vmem>>, %arg6: memref<1x32xf32, #tpu.memory_space<vmem>>, %arg7: memref<2x32xf32, #tpu.memory_space<vmem>>, %arg8: memref<2x16xf32, #tpu.memory_space<vmem>>) attributes {dimension_semantics = [#tpu.dimension_semantics<parallel>], iteration_bounds = array<i64: 1>, scalar_prefetch = 0 : i64, scratch_operands = 0 : i64, tpu.core_type = #tpu.core_type<tc>, window_params = [{transform_indices = @transform_0, window_bounds = array<i64: 2, 16, 32>}, {transform_indices = @transform_1, window_bounds = array<i64: 2, 16>}, {pipeline_mode = #tpu.pipeline_mode<synchronous>, transform_indices = @transform_2, window_bounds = array<i64: 32, 16>}, {pipeline_mode = #tpu.pipeline_mode<synchronous>, transform_indices = @transform_3, window_bounds = array<i64: 1, 16>}, {pipeline_mode = #tpu.pipeline_mode<synchronous>, transform_indices = @transform_4, window_bounds = array<i64: 32, 32>}, {pipeline_mode = #tpu.pipeline_mode<synchronous>, transform_indices = @transform_5, window_bounds = array<i64: 1, 32>}, {transform_indices = @transform_6, window_bounds = array<i64: 2, 32>}, {transform_indices = @transform_7, window_bounds = array<i64: 2, 16>}]} {
    %c0 = arith.constant 0 : index
    %c0_0 = arith.constant 0 : index
    %c0_1 = arith.constant 0 : index
    %0 = vector.load %arg1[%c0, %c0_0, %c0_1] : memref<2x16x32xf32, #tpu.memory_space<vmem>>, vector<2x16x32xf32>
    %1 = vector.shape_cast %0 : vector<2x16x32xf32> to vector<32x32xf32>
    %c0_2 = arith.constant 0 : index
    %c0_3 = arith.constant 0 : index
    %2 = vector.load %arg3[%c0_2, %c0_3] : memref<32x16xf32, #tpu.memory_space<vmem>>, vector<32x16xf32>
    %cst = arith.constant dense<0.000000e+00> : vector<32x16xf32>
    %3 = tpu.matmul %1, %2, %cst {dimension_numbers = #tpu.dot_dimension_numbers<[1], [0], [0], [1], [0, 0, 1, 1], [], []>} : vector<32x32xf32>, vector<32x16xf32>, vector<32x16xf32> -> vector<32x16xf32>
    %4 = math.tanh %3 : vector<32x16xf32>
    %5 = vector.shape_cast %4 : vector<32x16xf32> to vector<2x16x16xf32>
    %c0_4 = arith.constant 0 : index
    %c0_5 = arith.constant 0 : index
    %6 = vector.load %arg4[%c0_4, %c0_5] : memref<1x16xf32, #tpu.memory_space<vmem>>, vector<1x16xf32>
    %7 = vector.shape_cast %6 : vector<1x16xf32> to vector<1x1x16xf32>
    %8 = vector.broadcast %7 : vector<1x1x16xf32> to vector<2x16x16xf32>
    %9 = arith.mulf %5, %8 : vector<2x16x16xf32>
    %cst_6 = arith.constant dense<0.000000e+00> : vector<2x16xf32>
    %10 = vector.multi_reduction <add>, %9, %cst_6 [2] : vector<2x16x16xf32> to vector<2x16xf32>
    %c0_7 = arith.constant 0 : index
    %c0_8 = arith.constant 0 : index
    %11 = vector.load %arg2[%c0_7, %c0_8] : memref<2x16xf32, #tpu.memory_space<vmem>>, vector<2x16xf32>
    %cst_9 = arith.constant 0.000000e+00 : f32
    %12 = vector.broadcast %cst_9 : f32 to vector<2x16xf32>
    %13 = arith.cmpf oeq, %11, %12 : vector<2x16xf32>
    %cst_10 = arith.constant -1.000000e+09 : f32
    %14 = vector.broadcast %cst_10 : f32 to vector<2x16xf32>
    %15 = arith.select %13, %14, %10 : vector<2x16xi1>, vector<2x16xf32>
    %cst_11 = arith.constant dense<0xFF800000> : vector<2xf32>
    %16 = vector.multi_reduction <maximumf>, %15, %cst_11 [1] : vector<2x16xf32> to vector<2xf32>
    %17 = vector.shape_cast %16 : vector<2xf32> to vector<2x1xf32>
    %18 = vector.broadcast %17 : vector<2x1xf32> to vector<2x16xf32>
    %19 = arith.subf %15, %18 : vector<2x16xf32>
    %20 = math.exp %19 : vector<2x16xf32>
    %cst_12 = arith.constant dense<0.000000e+00> : vector<2xf32>
    %21 = vector.multi_reduction <add>, %20, %cst_12 [1] : vector<2x16xf32> to vector<2xf32>
    %22 = vector.shape_cast %21 : vector<2xf32> to vector<2x1xf32>
    %23 = vector.broadcast %22 : vector<2x1xf32> to vector<2x16xf32>
    %24 = arith.divf %20, %23 : vector<2x16xf32>
    %25 = vector.shape_cast %24 : vector<2x16xf32> to vector<2x16x1xf32>
    %26 = vector.broadcast %25 : vector<2x16x1xf32> to vector<2x16x32xf32>
    %27 = arith.mulf %26, %0 : vector<2x16x32xf32>
    %cst_13 = arith.constant dense<0.000000e+00> : vector<2x32xf32>
    %28 = vector.multi_reduction <add>, %27, %cst_13 [1] : vector<2x16x32xf32> to vector<2x32xf32>
    %c0_14 = arith.constant 0 : index
    %c0_15 = arith.constant 0 : index
    %29 = vector.load %arg5[%c0_14, %c0_15] : memref<32x32xf32, #tpu.memory_space<vmem>>, vector<32x32xf32>
    %cst_16 = arith.constant dense<0.000000e+00> : vector<2x32xf32>
    %30 = tpu.matmul %28, %29, %cst_16 {dimension_numbers = #tpu.dot_dimension_numbers<[1], [0], [0], [1], [0, 0, 1, 1], [], []>} : vector<2x32xf32>, vector<32x32xf32>, vector<2x32xf32> -> vector<2x32xf32>
    %c0_17 = arith.constant 0 : index
    %c0_18 = arith.constant 0 : index
    %31 = vector.load %arg6[%c0_17, %c0_18] : memref<1x32xf32, #tpu.memory_space<vmem>>, vector<1x32xf32>
    %32 = vector.broadcast %31 : vector<1x32xf32> to vector<2x32xf32>
    %33 = arith.addf %30, %32 : vector<2x32xf32>
    %c0_19 = arith.constant 0 : index
    %c0_20 = arith.constant 0 : index
    %34 = vector.load %arg7[%c0_19, %c0_20] : memref<2x32xf32, #tpu.memory_space<vmem>>, vector<2x32xf32>
    tpu.vector_store %arg7[%c0_19, %c0_20], %33 {strides = array<i32>} : memref<2x32xf32, #tpu.memory_space<vmem>>, vector<2x32xf32>,
    %c0_21 = arith.constant 0 : index
    %c0_22 = arith.constant 0 : index
    %35 = vector.load %arg8[%c0_21, %c0_22] : memref<2x16xf32, #tpu.memory_space<vmem>>, vector<2x16xf32>
    tpu.vector_store %arg8[%c0_21, %c0_22], %24 {strides = array<i32>} : memref<2x16xf32, #tpu.memory_space<vmem>>, vector<2x16xf32>,
    return
  }
  func.func @transform_0(%arg0: i32) -> (i32, i32, i32) {
    %c0_i32 = arith.constant 0 : i32
    %c0_i32_0 = arith.constant 0 : i32
    %c0_i32_1 = arith.constant 0 : i32
    return %arg0, %c0_i32, %c0_i32_0 : i32, i32, i32
  }
  func.func @transform_1(%arg0: i32) -> (i32, i32) {
    %c0_i32 = arith.constant 0 : i32
    %c0_i32_0 = arith.constant 0 : i32
    return %arg0, %c0_i32 : i32, i32
  }
  func.func @transform_2(%arg0: i32) -> (i32, i32) {
    %c0_i32 = arith.constant 0 : i32
    %c0_i32_0 = arith.constant 0 : i32
    %c0_i32_1 = arith.constant 0 : i32
    return %c0_i32, %c0_i32_0 : i32, i32
  }
  func.func @transform_3(%arg0: i32) -> (i32, i32) {
    %c0_i32 = arith.constant 0 : i32
    %c0_i32_0 = arith.constant 0 : i32
    %c0_i32_1 = arith.constant 0 : i32
    return %c0_i32, %c0_i32_0 : i32, i32
  }
  func.func @transform_4(%arg0: i32) -> (i32, i32) {
    %c0_i32 = arith.constant 0 : i32
    %c0_i32_0 = arith.constant 0 : i32
    %c0_i32_1 = arith.constant 0 : i32
    return %c0_i32, %c0_i32_0 : i32, i32
  }
  func.func @transform_5(%arg0: i32) -> (i32, i32) {
    %c0_i32 = arith.constant 0 : i32
    %c0_i32_0 = arith.constant 0 : i32
    %c0_i32_1 = arith.constant 0 : i32
    return %c0_i32, %c0_i32_0 : i32, i32
  }
  func.func @transform_6(%arg0: i32) -> (i32, i32) {
    %c0_i32 = arith.constant 0 : i32
    %c0_i32_0 = arith.constant 0 : i32
    return %arg0, %c0_i32 : i32, i32
  }
  func.func @transform_7(%arg0: i32) -> (i32, i32) {
    %c0_i32 = arith.constant 0 : i32
    %c0_i32_0 = arith.constant 0 : i32
    return %arg0, %c0_i32 : i32, i32
  }
}

</mosaic_0001>

<bundles_post_ra>
// kernel: tpu_custom_call.1
= control target key start
LH: loop header
LB: loop body
LE: loop exit
PB: predicated region body
PF: predicated region fallthrough
CT: control target
= control target key end

     0   :  { %13 = vsyncpa [#allocation3], 0  ;;  %s679_s0 = inlined_call_operand.vmem [shape: f32[2,16,32], index: 0, kind: input, shape index: {}]   ;;  %s680_s1 = inlined_call_operand.vmem [shape: f32[2,16], index: 1, kind: input, shape index: {}]   ;;  %s681_s2 = inlined_call_operand.vmem [shape: f32[32,16], index: 2, kind: input, shape index: {}]   ;;  %s682_s3 = inlined_call_operand.vmem [shape: f32[1,16], index: 3, kind: input, shape index: {}]   ;;  %s683_s4 = inlined_call_operand.hbm [shape: f32[32,32], index: 4, kind: input, shape index: {}]   ;;  %s684_s5 = inlined_call_operand.vmem [shape: f32[1,32], index: 5, kind: input, shape index: {}]   ;;  %s685_s6 = inlined_call_operand.hbm [shape: f32[2,32], index: 6, kind: output, shape index: {0}]   ;;  %s686_s7 = inlined_call_operand.hbm [shape: f32[2,16], index: 7, kind: output, shape index: {1}]  }
   0x1   :  { %14 = vsyncpa [#allocation4], 0 }
   0x2   :  { %15 = vsyncpa [#allocation7], 0  ;;  %s532_s24 = smov [#allocation2]   ;;  %s460_s28 = scalar_lea.hbm %s683_s4, 512 }
   0x3   :  { %s29_s25 = sshll.u32 %s532_s24, 4  ;;  %p461_p0 = scmp.ne.s32.totalorder %s683_s4, %s460_s28  ;;  %s30_s25 = int_to_ptr.vmem [resolvable:$true] %s29_s25 }
   0x4   :  { %p464_p1 = scmp.lt.u32.totalorder %s460_s28, %s683_s4 }
   0x6   :  { %p466_p2 = pnand %p464_p1, %p461_p0 }
   0x8   :  { %469 = shalt.err (!%p466_p2)
}
   0x9   :  { %s470_s10 = scalar_lea.vmem %s30_s25, 512  ;;  %p475_p4 = scmp.lt.s32.totalorder %s30_s25, %s30_s25 }
   0xa   :  { %p471_p3 = scmp.ne.s32.totalorder %s30_s25, %s470_s10  ;;  %p476_p5 = scmp.lt.s32.totalorder %s470_s10, %s470_s10 }
   0xc   :  { %p477_p6 = por %p476_p5, %p475_p4 }
   0xe   :  { %p478_p7 = pnand %p477_p6, %p471_p3 }
  0x10   :  { %481 = shalt.err (!%p478_p7)
}
  0x11   :  { %s533_s11 = smov 128   ;;  %s534_s12 = smov 8  }
  0x12   :  { %35 = dma.hbm_to_vmem [thread:$0]  %s683_s4, 512, %s30_s25, [#allocation3], %s533_s11, %s533_s11, %s534_s12  }
  0x13   :  { %526 = dma.done.wait [#allocation3], 512  }
  0x14   :  { %527 = vsyncadd [#allocation3], 4294966784  ;;  %vm49_vm0 = vcmask 261120   ;;  %v45_v0 = vld [vmem:[%s681_s2] sm:$0xff]  ;;  %v46_v1 = vld [vmem:[%s681_s2 + $0x8] sm:$0xff]  ;;  %vm162_vm1 = vcmask 130048   ;;  %v181_v27 = vlaneseq }
  0x15   :  { %v47_v2 = vld [vmem:[%s681_s2 + $0x10] sm:$0xff]  ;;  %v426_v3 = vpack.c.bf16 %v46_v1, %v45_v0  ;;  %v48_v4 = vld [vmem:[%s681_s2 + $0x18] sm:$0xff]  ;;  %v607_v5 = vld [vmem:[%s679_s0] sm:$0xff]  ;;  %vm192_vm2 = vcmask 130112   ;;  %vm203_vm3 = vcmask 1041409   ;;  %vm207_vm5 = vcmask 123904  }
  0x16   :  { %v430_v6 = vpack.c.bf16 %v48_v4, %v47_v2  ;;  %409 = vmatprep.mubr.msk.f32.mxu0 %vm49_vm0, %v607_v5  ;;  %v614_v7 = vld [vmem:[%s679_s0 + $0x8] sm:$0xff]  ;;  %v619_v8 = vld [vmem:[%s679_s0 + $0x10] sm:$0xff]  ;;  %v628_v9 = vld [vmem:[%s679_s0 + $0x18] sm:$0xff]  ;;  %v182_v28 = vand.u32 127, %v181_v27  ;;  %v184_v31 = vshrl.u32 %v181_v27, 7  ;;  %v535_v62 = vmov 0.0|0.0  }
  0x17   :  { %427 = vmatprep.subr.bf16.mxu0 %v426_v3  ;;  %v385_v14 = vld [vmem:[%s682_s3] ss:$0 sm:$0xff]  ;;  %v264_v60 = vld [vmem:[#allocation2 + $0x8] sm:$0xff]  ;;  %434 = vmatprep.subr.bf16.mxu1 %v535_v62  ;;  %v265_v63 = vld [vmem:[#allocation2 + $0x10] sm:$0xff]  ;;  %vm536_vm6 = vmmov 0   ;;  %v537_v2 = vmov 0.0  }
  0x18   :  { %429 = vmatpush3.bf16.msra.mxu0 %v426_v3  ;;  %v187_v29 = vadd.s32 4294967288, %v182_v28  ;;  %v185_v35 = vsub.s32 %v182_v28, %v184_v31  ;;  %v175_v37 = vld [vmem:[%s680_s1] sm:$0x3]  ;;  %v221_v53 = vsub.s32 0, %v184_v31  ;;  %v232_v57 = vsub.s32 1, %v184_v31  ;;  %v266_v0 = vld [vmem:[#allocation2 + $0x18] sm:$0xff]  ;;  %423 = vmatprep.mubr.msk.f32.mxu1 %vm536_vm6, %v537_v2 }
  0x19   :  { %431 = vmatprep.subr.bf16.mxu0 %v430_v6  ;;  %vm176_vm4 = vcmp.eq.f32.partialorder %v175_v37, 0.0  ;;  %v263_v59 = vld [vmem:[#allocation2] sm:$0xff]  ;;  %v438_v1 = vpack.c.bf16 %v266_v0, %v265_v63  ;;  %s538_s1 = smov [#allocation6]  }
  0x1a   :  { %v190_v32 = vsub.s32 %v187_v29, %v184_v31  ;;  %v435_v61 = vpack.c.bf16 %v264_v60, %v263_v59  ;;  %s368_s8 = sshll.u32 %s538_s1, 4  ;;  %s369_s8 = int_to_ptr.vmem [resolvable:$true] %s368_s8 }
  0x1b   :  { %s482_s9 = scalar_lea.vmem %s369_s8, 32  ;;  %p487_p9 = scmp.lt.s32.totalorder %s369_s8, %s369_s8 }
  0x1c   :  { %433 = vmatpush3.bf16.msra.mxu0 %v430_v6  ;;  %436 = vmatpush3.bf16.msra.mxu1 %v435_v61  ;;  %p483_p8 = scmp.ne.s32.totalorder %s369_s8, %s482_s9  ;;  %p488_p10 = scmp.lt.s32.totalorder %s482_s9, %s482_s9 }
  0x1d   :  { %437 = vmatprep.subr.bf16.mxu1 %v535_v62 }
  0x1e   :  { %p489_p11 = por %p488_p10, %p487_p9 }
  0x1f   :  { %410 = vmatmul.mubr.msk.f32.vlgmr.msra.gmra.mrb[0].mxu0 %vm49_vm0, %v614_v7 }
  0x20   :  { %412 = vmatprep.mubr.msk.f32.mxu0 %vm49_vm0, %v619_v8  ;;  %439 = vmatpush3.bf16.msra.mxu1 %v438_v1  ;;  %p490_p12 = pnand %p489_p11, %p483_p8 }
  0x23   :  { %413 = vmatmul.mubr.msk.f32.gmra.mrb[2].mxu0 %vm49_vm0, %v628_v9 }
  0xf2   :  { %v411_v10 = vpop.f32.mrb[0].mxu0 }
  0xf3   :  { %448 = vtanh.f32 %v411_v10  ;;  %v128_v11 = vpop.f32.mrb[1].mxu0 }
  0xf4   :  { %450 = vtanh.f32 %v128_v11 }
  0xf6   :  { %v414_v12 = vpop.f32.mrb[2].mxu0 }
  0xf7   :  { %452 = vtanh.f32 %v414_v12  ;;  %v138_v13 = vpop.f32.mrb[3].mxu0 }
  0xf8   :  { %454 = vtanh.f32 %v138_v13 }
  0xfd   :  { %v449_v15 = vpop.eup %448 }
  0xfe   :  { %v451_v16 = vpop.eup %450  ;;  %v159_v20 = vmul.f32 %v449_v15, %v385_v14 }
  0xff   :  { %v158_v17 = vmul.f32 %v451_v16, %v385_v14 }
 0x100   :  { %v166_v23 = vsel %vm162_vm1, %v159_v20, 0.0 }
 0x101   :  { %v453_v18 = vpop.eup %452  ;;  %v163_v19 = vsel %vm162_vm1, %v158_v17, 0.0 }
 0x102   :  { %v455_v21 = vpop.eup %454  ;;  %164 = vadd.xlane.f32.xlu0 %v163_v19  ;;  %v161_v25 = vmul.f32 %v453_v18, %v385_v14 }
 0x103   :  { %v160_v22 = vmul.f32 %v455_v21, %v385_v14 }
 0x104   :  { %v172_v26 = vsel %vm162_vm1, %v161_v25, 0.0 }
 0x105   :  { %v169_v24 = vsel %vm162_vm1, %v160_v22, 0.0 }
 0x106   :  { %167 = vadd.xlane.f32.xlu0 %v166_v23  ;;  %170 = vadd.xlane.f32.xlu1 %v169_v24 }
 0x10a   :  { %173 = vadd.xlane.f32.xlu1 %v172_v26 }
 0x18f   :  { %v165_v30 = vpop.xlane.xlu0 %164 }
 0x190   :  { %v186_v39 = vrot.slane %v165_v30, %v185_v35 }
 0x193   :  { %v168_v33 = vpop.xlane.xlu0 %167  ;;  %v171_v34 = vpop.xlane.xlu1 %170 }
 0x194   :  { %v191_v36 = vrot.slane %v168_v33, %v190_v32  ;;  %v197_v40 = vrot.slane %v171_v34, %v185_v35 }
 0x196   :  { %v193_v42 = vsel %vm192_vm2, %v191_v36, %v186_v39 }
 0x197   :  { %v174_v38 = vpop.xlane.xlu1 %173 }
 0x198   :  { %v201_v41 = vrot.slane %v174_v38, %v190_v32 }
 0x19a   :  { %v202_v43 = vsel %vm192_vm2, %v201_v41, %v197_v40 }
 0x19b   :  { %v204_v44 = vsel %vm203_vm3, %v202_v43, %v193_v42 }
 0x19c   :  { %v206_v45 = vsel %vm176_vm4, -1e+09, %v204_v44 }
 0x19d   :  { %v208_v46 = vsel %vm207_vm5, %v206_v45, -inf }
 0x19e   :  { %209 = vmax.xlane.f32.xlu0 %v208_v46 }
 0x22b   :  { %v210_v47 = vpop.xlane.xlu0 %209 }
 0x22c   :  { %v211_v48 = vsub.f32 %v206_v45, %v210_v47 }
 0x22e   :  { %v212_v49 = vmul.f32 1.442695, %v211_v48 }
 0x230   :  { %456 = vpow2.f32 %v212_v49 }
 0x23a   :  { %v457_v50 = vpop.eup %456 }
 0x23b   :  { %v214_v51 = vsel %vm207_vm5, %v457_v50, 0.0 }
 0x23c   :  { %215 = vadd.xlane.f32.xlu1 %v214_v51 }
 0x2c9   :  { %v216_v52 = vpop.xlane.xlu1 %215 }
 0x2ca   :  { %458 = vrcp.f32 %v216_v52 }
 0x2d4   :  { %v459_v54 = vpop.eup %458 }
 0x2d5   :  { %v218_v55 = vmul.f32 %v459_v54, %v457_v50 }
 0x2d7   :  { %v222_v56 = vrot.slane %v218_v55, %v221_v53  ;;  %351 = vst.msk [vmem:[#allocation6] sm:$0x3] %vm207_vm5, %v218_v55  ;;  %v233_v58 = vrot.slane %v218_v55, %v232_v57 }
 0x2d9   :  { %228 = vbcast.lane.b32.xlu1 %v222_v56, 264  ;;  %224 = vbcast.lane.b32.xlu0 %v222_v56, 256 }
 0x2dd   :  { %235 = vbcast.lane.b32.xlu1 %v233_v58, 256 }
 0x2e1   :  { %239 = vbcast.lane.b32.xlu1 %v233_v58, 264 }
 0x34b   :  { %v229_v3 = vpop.permute.xlu1 %228  ;;  %v225_v4 = vpop.permute.xlu0 %224 }
 0x34c   :  { %v242_v6 = vmul.f32 %v229_v3, %v614_v7  ;;  %v241_v10 = vmul.f32 %v225_v4, %v607_v5 }
 0x34e   :  { %v246_v11 = vsel %vm49_vm0, %v242_v6, 0.0  ;;  %v245_v12 = vsel %vm49_vm0, %v241_v10, 0.0 }
 0x34f   :  { %v247_v13 = vadd.f32 %v246_v11, %v245_v12  ;;  %v236_v14 = vpop.permute.xlu1 %235 }
 0x350   :  { %v243_v16 = vmul.f32 %v236_v14, %v619_v8 }
 0x351   :  { %v248_v15 = vrot.slane %v247_v13, 4 }
 0x352   :  { %v254_v20 = vsel %vm49_vm0, %v243_v16, 0.0 }
 0x353   :  { %v249_v17 = vadd.f32 %v248_v15, %v247_v13  ;;  %v240_v18 = vpop.permute.xlu1 %239 }
 0x354   :  { %v244_v19 = vmul.f32 %v240_v18, %v628_v9 }
 0x355   :  { %v250_v7 = vrot.slane %v249_v17, 2 }
 0x356   :  { %v255_v21 = vsel %vm49_vm0, %v244_v19, 0.0 }
 0x357   :  { %v256_v22 = vadd.f32 %v255_v21, %v254_v20  ;;  %v251_v23 = vadd.f32 %v250_v7, %v249_v17 }
 0x359   :  { %v257_v5 = vrot.slane %v256_v22, 4  ;;  %v252_v26 = vrot.slane %v251_v23, 1 }
 0x35b   :  { %v258_v24 = vadd.f32 %v257_v5, %v256_v22  ;;  %v253_v29 = vadd.f32 %v252_v26, %v251_v23 }
 0x35d   :  { %v259_v25 = vrot.slane %v258_v24, 2 }
 0x35f   :  { %v260_v27 = vadd.f32 %v259_v25, %v258_v24 }
 0x361   :  { %v261_v28 = vrot.slane %v260_v27, 1 }
 0x363   :  { %v262_v30 = vadd.f32 %v261_v28, %v260_v27 }
 0x365   :  { %v276_v8 = vsel %vm203_vm3, %v262_v30, %v253_v29 }
 0x366   :  { %424 = vmatmul.mubr.msk.f32.vlgmr.msra.gmra.mrb[0].mxu1 %vm49_vm0, %v276_v8 }
 0x367   :  { %493 = shalt.err (!%p490_p12)
}
 0x368   :  { %s494_s12 = scalar_lea.hbm %s686_s7, 32 }
 0x369   :  { %p495_p13 = scmp.ne.s32.totalorder %s686_s7, %s494_s12  ;;  %p498_p0 = scmp.lt.u32.totalorder %s494_s12, %s686_s7 }
 0x36b   :  { %p500_p1 = pnand %p498_p0, %p495_p13 }
 0x36d   :  { %503 = shalt.err (!%p500_p1)
}
 0x36e   :  { %371 = dma.vmem_to_hbm [thread:$0]  %s369_s8, 32, %s686_s7, [#allocation7]   ;;  %v386_v9 = vld [vmem:[%s684_s5] ss:$0 sm:$0xff]  ;;  %vm349_vm7 = vcmask 254976  }
 0x36f   :  { %s539_s21 = smov [#allocation5]  }
 0x370   :  { %s358_s22 = sshll.u32 %s539_s21, 4  ;;  %s359_s22 = int_to_ptr.vmem [resolvable:$true] %s358_s22 }
 0x371   :  { %s504_s4 = scalar_lea.vmem %s359_s22, 32  ;;  %p509_p3 = scmp.lt.s32.totalorder %s359_s22, %s359_s22 }
 0x372   :  { %p505_p2 = scmp.ne.s32.totalorder %s359_s22, %s504_s4  ;;  %p510_p4 = scmp.lt.s32.totalorder %s504_s4, %s504_s4 }
 0x374   :  { %p511_p5 = por %p510_p4, %p509_p3 }
 0x376   :  { %p512_p6 = pnand %p511_p5, %p505_p2 }
 0x439   :  { %v345_v31 = vpop.f32.mrb[0].mxu1 }
 0x43a   :  { %v346_v32 = vadd.f32 %v386_v9, %v345_v31  ;;  %v425_v33 = vpop.f32.mrb[1].mxu1 }
 0x43c   :  { %350 = vst.msk [vmem:[#allocation5] sm:$0x3] %vm349_vm7, %v346_v32 }
 0x43d   :  { %515 = shalt.err (!%p512_p6)
}
 0x43e   :  { %s516_s24 = scalar_lea.hbm %s685_s6, 32 }
 0x43f   :  { %p517_p7 = scmp.ne.s32.totalorder %s685_s6, %s516_s24  ;;  %p520_p8 = scmp.lt.u32.totalorder %s516_s24, %s685_s6 }
 0x441   :  { %p522_p9 = pnand %p520_p8, %p517_p7 }
 0x443   :  { %525 = shalt.err (!%p522_p9)
}
 0x444   :  { %361 = dma.vmem_to_hbm [thread:$0]  %s359_s22, 32, %s685_s6, [#allocation4]  }
 0x445   :  { %528 = dma.done.wait [#allocation4], 32  }
 0x446   :  { %529 = vsyncadd [#allocation4], 4294967264 }
 0x447   :  { %530 = dma.done.wait [#allocation7], 32  }
 0x448   :  { %531 = vsyncadd [#allocation7], 4294967264 }
 0x449   :  { %378 = vsyncpa [#allocation3], 1 }
 0x44a   :  { %379 = vsyncpa [#allocation4], 1 }
 0x44b   :  { %380 = vsyncpa [#allocation7], 1 }

</bundles_post_ra>
